<compile_context>
chip_gen: v6e
topology: v6e:2x2x1
jax: 0.10.0
libtpu: 0.0.40
codegen_flags: <defaults>
</compile_context>

<pallas_src>
import functools
import math

import jax
import jax.numpy as jnp
from jax.experimental import pallas as pl
from jax.experimental.pallas import tpu as pltpu

TAU = 10.0
EPS = 1e-8


def _phi_kernel(x_ref, w_ref, b_ref, out_ref, hpart_ref, *, rows, bm):
    x = x_ref[...].astype(jnp.float32)                # (bm, L)
    z = w_ref[...] * x + b_ref[...]                   # z = tau*(w*x + b)

    # Sigmoid via tanh (1 EUP push); sign handled on the VPU.
    a = jnp.abs(z)
    t = jnp.tanh(0.5 * a)                             # t in [0, 1]
    p_pos = 0.5 + 0.5 * t                             # sigmoid(|z|) in [0.5, 1]
    p = jnp.where(z >= 0.0, p_pos, 1.0 - p_pos)
    out_ref[...] = p.astype(out_ref.dtype)

    # Binary entropy, symmetric & overflow-free:
    #   H(z) = softplus(-|z|) + |z| * (1 - sigmoid(|z|))
    #        = -log((1+t)/2)  + |z| * (1-t)/2          (both terms >= 0)
    h = a * (0.5 - 0.5 * t) - jnp.log(p_pos)          # 1 EUP log + VPU

    # Mask tail rows of a partial last block before the sublane reduce.
    if rows % bm != 0:
        rid = pl.program_id(0) * bm + jax.lax.broadcasted_iota(
            jnp.int32, h.shape, 0)
        h = jnp.where(rid < rows, h, 0.0)

    # Lane-dense per-block partial: cheap VPU sublane adds, unmasked stores.
    hpart_ref[...] = jnp.sum(h, axis=0, keepdims=True)   # (1, L)


def _choose_layout(n_elems, feat):
    """Pick (rows, lane_w, k): x reshaped to (rows, lane_w); params tiled
    k = lane_w // feat times along the lane axis."""
    if feat % 128 == 0:
        return n_elems // feat, feat, 1
    # gcd-based lane fold: smallest lane-dense width that is a multiple of F.
    base = feat * (128 // math.gcd(feat, 128))        # = lcm(feat, 128)
    if n_elems % base == 0:
        lane_w = base
        for mult in (4, 2):                           # widen if it still divides
            if base * mult <= 512 and n_elems % (base * mult) == 0:
                lane_w = base * mult
                break
        return n_elems // lane_w, lane_w, lane_w // feat
    # Fallback: keep feature dim as lane dim (correct, just not lane-dense).
    return n_elems // feat, feat, 1


def _choose_block_rows(rows, lane_w):
    # ~2 MiB of f32 per block: double-buffered in+out ~= 8 MiB live VMEM,
    # safe on v5e (16 MiB scoped default) and v7x (32 MiB default / 64 MiB phys).
    target = max(8, (1 << 19) // lane_w)
    if rows <= target:
        return rows                                   # full-dim block is allowed
    return max(8, (target // 8) * 8)                  # keep sublane dim % 8 == 0


def phi_forward(x, w_, b, *, tau=TAU, output_dtype=None):
    """x: (..., F); w_, b: (F,). Returns (output, entropy_scalar)."""
    orig_shape = x.shape
    feat = orig_shape[-1]
    n = x.size
    out_dtype = x.dtype if output_dtype is None else output_dtype

    rows, lane_w, k = _choose_layout(n, feat)
    x2d = x.reshape(rows, lane_w)

    # Fold tau and exp(.) into tiny per-lane parameter rows.
    w_row = jnp.tile(tau * jnp.exp(w_.astype(jnp.float32)), k).reshape(1, lane_w)
    b_row = jnp.tile(tau * b.astype(jnp.float32), k).reshape(1, lane_w)

    bm = _choose_block_rows(rows, lane_w)
    nblk = pl.cdiv(rows, bm)

    kernel = functools.partial(_phi_kernel, rows=rows, bm=bm)

    in_bytes = n * x.dtype.itemsize + 2 * lane_w * 4
    out_bytes = n * jnp.dtype(out_dtype).itemsize + nblk * lane_w * 4
    cost = pl.CostEstimate(
        flops=8 * n,
        transcendentals=2 * n,
        bytes_accessed=in_bytes + out_bytes,
    )

    out2d, hpart = pl.pallas_call(
        kernel,
        out_shape=(
            jax.ShapeDtypeStruct((rows, lane_w), out_dtype),
            jax.ShapeDtypeStruct((nblk, lane_w), jnp.float32),
        ),
        grid=(nblk,),
        in_specs=[
            pl.BlockSpec((bm, lane_w), lambda i: (i, 0)),
            pl.BlockSpec((1, lane_w), lambda i: (0, 0)),   # resident param row
            pl.BlockSpec((1, lane_w), lambda i: (0, 0)),
        ],
        out_specs=(
            pl.BlockSpec((bm, lane_w), lambda i: (i, 0)),
            pl.BlockSpec((1, lane_w), lambda i: (i, 0)),   # lane-dense partial
        ),
        compiler_params=pltpu.CompilerParams(
            dimension_semantics=("parallel",)),
        cost_estimate=cost,
    )(x2d, w_row, b_row)

    entropy = jnp.sum(hpart) / n
    return out2d.reshape(orig_shape), entropy


if __name__ == "__main__":
    features = 32
    batch, seq = 2, 8

    key = jax.random.PRNGKey(0)
    x = jax.random.normal(key, (batch, seq, features), dtype=jnp.float32)

    # Deterministic parameter init matching Phi.reset_parameters():
    #   w_ = log(1 + 1e-8)  (so w = exp(w_) = 1 + 1e-8),  b = 0
    w_ = jnp.full((features,), jnp.log(1.0 + 1e-8), dtype=jnp.float32)
    b = jnp.zeros((features,), dtype=jnp.float32)

    out, entropy = phi_forward(x, w_, b)
    jax.block_until_ready((out, entropy))

    # Pure-JAX reference of the original PyTorch formulation.
    w = jnp.exp(w_)
    p_ref = 1.0 / (1.0 + jnp.exp(-TAU * (w * x + b)))
    ent_ref = (-(p_ref * jnp.log(p_ref + EPS)
                 + (1.0 - p_ref) * jnp.log(1.0 - p_ref + EPS))).mean()

    assert jnp.allclose(out, p_ref, atol=2e-3, rtol=2e-3), \
        float(jnp.max(jnp.abs(out - p_ref)))
    assert jnp.allclose(entropy, ent_ref, atol=2e-3, rtol=2e-3), \
        (float(entropy), float(ent_ref))

    print("KERNEL_OK")
</pallas_src>

<mosaic_0001>
module attributes {stable_mosaic.version = 11 : i64} {
  func.func @_phi_kernel(%arg0: i32, %arg1: memref<1x512xf32, #tpu.memory_space<vmem>>, %arg2: memref<1x512xf32, #tpu.memory_space<vmem>>, %arg3: memref<1x512xf32, #tpu.memory_space<vmem>>, %arg4: memref<1x512xf32, #tpu.memory_space<vmem>>, %arg5: memref<1x512xf32, #tpu.memory_space<vmem>>) attributes {dimension_semantics = [#tpu.dimension_semantics<parallel>], iteration_bounds = array<i64: 1>, scalar_prefetch = 0 : i64, scratch_operands = 0 : i64, tpu.core_type = #tpu.core_type<tc>, window_params = [{transform_indices = @transform_0, window_bounds = array<i64: 1, 512>}, {pipeline_mode = #tpu.pipeline_mode<synchronous>, transform_indices = @transform_1, window_bounds = array<i64: 1, 512>}, {pipeline_mode = #tpu.pipeline_mode<synchronous>, transform_indices = @transform_2, window_bounds = array<i64: 1, 512>}, {transform_indices = @transform_3, window_bounds = array<i64: 1, 512>}, {transform_indices = @transform_4, window_bounds = array<i64: 1, 512>}]} {
    %c0 = arith.constant 0 : index
    %c0_0 = arith.constant 0 : index
    %0 = vector.load %arg1[%c0, %c0_0] : memref<1x512xf32, #tpu.memory_space<vmem>>, vector<1x512xf32>
    %c0_1 = arith.constant 0 : index
    %c0_2 = arith.constant 0 : index
    %1 = vector.load %arg2[%c0_1, %c0_2] : memref<1x512xf32, #tpu.memory_space<vmem>>, vector<1x512xf32>
    %2 = arith.mulf %1, %0 : vector<1x512xf32>
    %c0_3 = arith.constant 0 : index
    %c0_4 = arith.constant 0 : index
    %3 = vector.load %arg3[%c0_3, %c0_4] : memref<1x512xf32, #tpu.memory_space<vmem>>, vector<1x512xf32>
    %4 = arith.addf %2, %3 : vector<1x512xf32>
    %5 = math.absf %4 : vector<1x512xf32>
    %cst = arith.constant 5.000000e-01 : f32
    %6 = vector.broadcast %cst : f32 to vector<1x512xf32>
    %7 = arith.mulf %6, %5 : vector<1x512xf32>
    %8 = math.tanh %7 : vector<1x512xf32>
    %cst_5 = arith.constant 5.000000e-01 : f32
    %9 = vector.broadcast %cst_5 : f32 to vector<1x512xf32>
    %10 = arith.mulf %9, %8 : vector<1x512xf32>
    %cst_6 = arith.constant 5.000000e-01 : f32
    %11 = vector.broadcast %cst_6 : f32 to vector<1x512xf32>
    %12 = arith.addf %11, %10 : vector<1x512xf32>
    %cst_7 = arith.constant 0.000000e+00 : f32
    %13 = vector.broadcast %cst_7 : f32 to vector<1x512xf32>
    %14 = arith.cmpf oge, %4, %13 : vector<1x512xf32>
    %cst_8 = arith.constant 1.000000e+00 : f32
    %15 = vector.broadcast %cst_8 : f32 to vector<1x512xf32>
    %16 = arith.subf %15, %12 : vector<1x512xf32>
    %17 = arith.select %14, %12, %16 : vector<1x512xi1>, vector<1x512xf32>
    %c0_9 = arith.constant 0 : index
    %c0_10 = arith.constant 0 : index
    %18 = vector.load %arg4[%c0_9, %c0_10] : memref<1x512xf32, #tpu.memory_space<vmem>>, vector<1x512xf32>
    tpu.vector_store %arg4[%c0_9, %c0_10], %17 {strides = array<i32>} : memref<1x512xf32, #tpu.memory_space<vmem>>, vector<1x512xf32>,
    %cst_11 = arith.constant 5.000000e-01 : f32
    %19 = vector.broadcast %cst_11 : f32 to vector<1x512xf32>
    %20 = arith.mulf %19, %8 : vector<1x512xf32>
    %cst_12 = arith.constant 5.000000e-01 : f32
    %21 = vector.broadcast %cst_12 : f32 to vector<1x512xf32>
    %22 = arith.subf %21, %20 : vector<1x512xf32>
    %23 = arith.mulf %5, %22 : vector<1x512xf32>
    %24 = math.log %12 : vector<1x512xf32>
    %25 = arith.subf %23, %24 : vector<1x512xf32>
    %cst_13 = arith.constant dense<0.000000e+00> : vector<512xf32>
    %26 = vector.multi_reduction <add>, %25, %cst_13 [0] : vector<1x512xf32> to vector<512xf32>
    %27 = vector.shape_cast %26 : vector<512xf32> to vector<1x512xf32>
    %c0_14 = arith.constant 0 : index
    %c0_15 = arith.constant 0 : index
    %28 = vector.load %arg5[%c0_14, %c0_15] : memref<1x512xf32, #tpu.memory_space<vmem>>, vector<1x512xf32>
    tpu.vector_store %arg5[%c0_14, %c0_15], %27 {strides = array<i32>} : memref<1x512xf32, #tpu.memory_space<vmem>>, vector<1x512xf32>,
    return
  }
  func.func @transform_0(%arg0: i32) -> (i32, i32) {
    %c0_i32 = arith.constant 0 : i32
    %c0_i32_0 = arith.constant 0 : i32
    return %arg0, %c0_i32 : i32, i32
  }
  func.func @transform_1(%arg0: i32) -> (i32, i32) {
    %c0_i32 = arith.constant 0 : i32
    %c0_i32_0 = arith.constant 0 : i32
    %c0_i32_1 = arith.constant 0 : i32
    return %c0_i32, %c0_i32_0 : i32, i32
  }
  func.func @transform_2(%arg0: i32) -> (i32, i32) {
    %c0_i32 = arith.constant 0 : i32
    %c0_i32_0 = arith.constant 0 : i32
    %c0_i32_1 = arith.constant 0 : i32
    return %c0_i32, %c0_i32_0 : i32, i32
  }
  func.func @transform_3(%arg0: i32) -> (i32, i32) {
    %c0_i32 = arith.constant 0 : i32
    %c0_i32_0 = arith.constant 0 : i32
    return %arg0, %c0_i32 : i32, i32
  }
  func.func @transform_4(%arg0: i32) -> (i32, i32) {
    %c0_i32 = arith.constant 0 : i32
    %c0_i32_0 = arith.constant 0 : i32
    return %arg0, %c0_i32 : i32, i32
  }
}

</mosaic_0001>

<bundles_post_ra>
// kernel: tpu_custom_call.1
= control target key start
LH: loop header
LB: loop body
LE: loop exit
PB: predicated region body
PF: predicated region fallthrough
CT: control target
= control target key end

     0   :  { %10 = vsyncpa [#allocation3], 0  ;;  %s278_s0 = inlined_call_operand.hbm [shape: f32[1,512], index: 0, kind: input, shape index: {}]   ;;  %s279_s1 = inlined_call_operand.hbm [shape: f32[1,512], index: 1, kind: input, shape index: {}]   ;;  %s280_s2 = inlined_call_operand.hbm [shape: f32[1,512], index: 2, kind: input, shape index: {}]   ;;  %s281_s3 = inlined_call_operand.hbm [shape: f32[1,512], index: 3, kind: output, shape index: {0}]   ;;  %s282_s4 = inlined_call_operand.hbm [shape: f32[1,512], index: 4, kind: output, shape index: {1}]  }
   0x1   :  { %11 = vsyncpa [#allocation6], 0 }
   0x2   :  { %12 = vsyncpa [#allocation4], 0 }
   0x3   :  { %13 = vsyncpa [#allocation10], 0  ;;  %s225_s15 = smov [#allocation5]   ;;  %s226_s17 = smov [#allocation2]  }
   0x4   :  { %s30_s16 = sshll.u32 %s225_s15, 4  ;;  %s20_s18 = sshll.u32 %s226_s17, 4  ;;  %s31_s16 = int_to_ptr.vmem [resolvable:$true] %s30_s16  ;;  %s21_s18 = int_to_ptr.vmem [resolvable:$true] %s20_s18 }
   0x5   :  { %s125_s19 = scalar_lea.vmem %s31_s16, 64  ;;  %p130_p1 = scmp.lt.s32.totalorder %s31_s16, %s31_s16 }
   0x6   :  { %p126_p0 = scmp.ne.s32.totalorder %s31_s16, %s125_s19  ;;  %p131_p2 = scmp.lt.s32.totalorder %s125_s19, %s125_s19 }
   0x8   :  { %p132_p3 = por %p131_p2, %p130_p1 }
   0xa   :  { %p133_p4 = pnand %p132_p3, %p126_p0 }
   0xc   :  { %136 = shalt.err (!%p133_p4)
}
   0xd   :  { %33 = dma.hbm_to_vmem [thread:$0]  %s279_s1, 64, %s31_s16, [#allocation6]  }
   0xe   :  { %s145_s22 = scalar_lea.vmem %s21_s18, 64  ;;  %p150_p6 = scmp.lt.s32.totalorder %s21_s18, %s21_s18 }
   0xf   :  { %p146_p5 = scmp.ne.s32.totalorder %s21_s18, %s145_s22  ;;  %p151_p7 = scmp.lt.s32.totalorder %s145_s22, %s145_s22 }
  0x11   :  { %p152_p8 = por %p151_p7, %p150_p6 }
  0x13   :  { %p153_p9 = pnand %p152_p8, %p146_p5 }
  0x15   :  { %156 = shalt.err (!%p153_p9)
}
  0x16   :  { %23 = dma.hbm_to_vmem [thread:$0]  %s278_s0, 64, %s21_s18, [#allocation3]  }
  0x17   :  { %s227_s25 = smov [#allocation7]  }
  0x18   :  { %s40_s26 = sshll.u32 %s227_s25, 4  ;;  %s41_s26 = int_to_ptr.vmem [resolvable:$true] %s40_s26 }
  0x19   :  { %s165_s27 = scalar_lea.vmem %s41_s26, 64  ;;  %p170_p11 = scmp.lt.s32.totalorder %s41_s26, %s41_s26 }
  0x1a   :  { %p166_p10 = scmp.ne.s32.totalorder %s41_s26, %s165_s27  ;;  %p171_p12 = scmp.lt.s32.totalorder %s165_s27, %s165_s27 }
  0x1c   :  { %p172_p13 = por %p171_p12, %p170_p11 }
  0x1e   :  { %p173_p0 = pnand %p172_p13, %p166_p10 }
  0x20   :  { %176 = shalt.err (!%p173_p0)
}
  0x21   :  { %43 = dma.hbm_to_vmem [thread:$0]  %s280_s2, 64, %s41_s26, [#allocation6]  }
  0x22   :  { %217 = dma.done.wait [#allocation3], 64  }
  0x23   :  { %218 = vsyncadd [#allocation3], 4294967232 }
  0x24   :  { %219 = dma.done.wait [#allocation6], 128  }
  0x25   :  { %220 = vsyncadd [#allocation6], 4294967168  ;;  %v53_v0 = vld [vmem:[#allocation2] sm:$0xf]  ;;  %v54_v1 = vld [vmem:[#allocation5] sm:$0xf]  ;;  %v66_v9 = vlaneseq }
  0x26   :  { %v56_v2 = vld [vmem:[#allocation7] sm:$0xf]  ;;  %v55_v3 = vmul.f32 %v54_v1, %v53_v0  ;;  %s228_s0 = smov [#allocation8]  }
  0x27   :  { %s84_s29 = sshll.u32 %s228_s0, 4  ;;  %vm264_vm1 = vcmp.lt.s32.totalorder %v66_v9, 512  ;;  %s85_s29 = int_to_ptr.vmem [resolvable:$true] %s84_s29 }
  0x28   :  { %v57_v4 = vadd.f32 %v56_v2, %v55_v3  ;;  %s177_s2 = scalar_lea.vmem %s85_s29, 64  ;;  %p182_p2 = scmp.lt.s32.totalorder %s85_s29, %s85_s29 }
  0x29   :  { %p178_p1 = scmp.ne.s32.totalorder %s85_s29, %s177_s2  ;;  %p183_p3 = scmp.lt.s32.totalorder %s177_s2, %s177_s2 }
  0x2a   :  { %v58_v5 = vand.u32 2147483647, %v57_v4  ;;  %vm63_vm0 = vcmp.ge.f32.partialorder %v57_v4, 0.0 }
  0x2b   :  { %p184_p4 = por %p183_p3, %p182_p2 }
  0x2c   :  { %v59_v6 = vmul.f32 0.5, %v58_v5 }
  0x2d   :  { %p185_p5 = pnand %p184_p4, %p178_p1 }
  0x2e   :  { %113 = vtanh.f32 %v59_v6 }
  0x3b   :  { %v114_v7 = vpop.eup %113 }
  0x3c   :  { %v61_v8 = vmul.f32 0.5, %v114_v7 }
  0x3e   :  { %v62_v10 = vadd.f32 0.5, %v61_v8 }
  0x40   :  { %v64_v11 = vsub.f32 1.0, %v62_v10  ;;  %115 = vlog2.f32 %v62_v10 }
  0x42   :  { %v65_v13 = vsel %vm63_vm0, %v62_v10, %v64_v11 }
  0x43   :  { %70 = vst.msk [vmem:[#allocation8] sm:$0xf] %vm264_vm1, %v65_v13 }
  0x44   :  { %188 = shalt.err (!%p185_p5)
}
  0x45   :  { %87 = dma.vmem_to_hbm [thread:$0]  %s85_s29, 64, %s281_s3, [#allocation4]   ;;  %v71_v14 = vsub.f32 0.5, %v61_v8 }
  0x46   :  { %s229_s6 = smov [#allocation9]  }
  0x47   :  { %v72_v15 = vmul.f32 %v71_v14, %v58_v5  ;;  %s94_s7 = sshll.u32 %s229_s6, 4  ;;  %s95_s7 = int_to_ptr.vmem [resolvable:$true] %s94_s7 }
  0x48   :  { %s197_s8 = scalar_lea.vmem %s95_s7, 64  ;;  %p202_p7 = scmp.lt.s32.totalorder %s95_s7, %s95_s7 }
  0x49   :  { %p198_p6 = scmp.ne.s32.totalorder %s95_s7, %s197_s8  ;;  %p203_p8 = scmp.lt.s32.totalorder %s197_s8, %s197_s8 }
  0x4b   :  { %p204_p9 = por %p203_p8, %p202_p7 }
  0x4d   :  { %v116_v16 = vpop.eup %115  ;;  %p205_p10 = pnand %p204_p9, %p198_p6 }
  0x4e   :  { %v74_v17 = vmul.f32 0.6931472, %v116_v16 }
  0x50   :  { %v75_v18 = vsub.f32 %v72_v15, %v74_v17 }
  0x52   :  { %77 = vst.msk [vmem:[#allocation9] sm:$0xf] %vm264_vm1, %v75_v18 }
  0x53   :  { %208 = shalt.err (!%p205_p10)
}
  0x54   :  { %97 = dma.vmem_to_hbm [thread:$0]  %s95_s7, 64, %s282_s4, [#allocation10]  }
  0x55   :  { %221 = dma.done.wait [#allocation4], 64  }
  0x56   :  { %222 = vsyncadd [#allocation4], 4294967232 }
  0x57   :  { %223 = dma.done.wait [#allocation10], 64  }
  0x58   :  { %224 = vsyncadd [#allocation10], 4294967232 }
  0x59   :  { %104 = vsyncpa [#allocation3], 1 }
  0x5a   :  { %105 = vsyncpa [#allocation6], 1 }
  0x5b   :  { %106 = vsyncpa [#allocation4], 1 }
  0x5c   :  { %107 = vsyncpa [#allocation10], 1 }

</bundles_post_ra>
